<compile_context>
chip_gen: v7x
topology: tpu7x:2x2x1
jax: 0.10.0
libtpu: 0.0.40
codegen_flags: <defaults>
</compile_context>

<pallas_src>
import functools

import jax
import jax.numpy as jnp
from jax import lax
from jax.experimental import pallas as pl
from jax.experimental.pallas import tpu as pltpu


def _round_up(a, b):
    return (a + b - 1) // b * b


def _device_kind():
    try:
        return jax.devices()[0].device_kind.lower()
    except Exception:
        return ""


def _vmem_cap_bytes():
    kind = _device_kind()
    if "v7" in kind:
        return 56 * 2**20      # v7x: 64 MiB physical, leave Mosaic headroom
    return 100 * 2**20         # v5e / v6e: 128 MiB physical


def _default_token_tile():
    kind = _device_kind()
    if "v7" in kind:
        return 512
    if "v5" in kind:
        return 384
    return 1024                # v6e and others


# ---------------------------------------------------------------------------
# One-time parameter preparation (hoisted relayout / cast / lane padding).
# ---------------------------------------------------------------------------
def prepare_params(params, lane=128):
    n_exp, e_sz, d_in = params["wg"].shape
    d_out = params["wd"].shape[1]
    e_pad = _round_up(e_sz, lane)
    col_pad = ((0, 0), (0, 0), (0, e_pad - e_sz))
    b_pad = ((0, 0), (0, e_pad - e_sz))

    wg_t = jnp.transpose(params["wg"], (0, 2, 1))          # (E, d_in, e_sz)
    wu_t = jnp.transpose(params["wu"], (0, 2, 1))          # (E, d_in, e_sz)
    wgu = jnp.concatenate(
        [jnp.pad(wg_t, col_pad), jnp.pad(wu_t, col_pad)], axis=2
    ).astype(jnp.bfloat16)                                 # (E, d_in, 2*e_pad)

    bgu = jnp.concatenate(
        [jnp.pad(params["bg"], b_pad), jnp.pad(params["bu"], b_pad)], axis=1
    ).reshape(n_exp, 1, 2 * e_pad).astype(jnp.float32)     # (E, 1, 2*e_pad)

    wd_t = jnp.transpose(params["wd"], (0, 2, 1))          # (E, e_sz, d_out)
    wd = jnp.pad(
        wd_t, ((0, 0), (0, e_pad - e_sz), (0, 0))
    ).astype(jnp.bfloat16)                                 # (E, e_pad, d_out)

    bd_all = params["bd"].astype(jnp.float32)              # (E, d_out)

    gw1_t = jnp.transpose(params["gw1"]).astype(jnp.bfloat16)  # (d_in, E)
    gw2_t = jnp.transpose(params["gw2"]).astype(jnp.bfloat16)  # (E, E)

    return {
        "wgu": wgu, "bgu": bgu, "wd": wd, "bd_all": bd_all,
        "gw1_t": gw1_t, "gw2_t": gw2_t,
        "e_pad": e_pad, "n_exp": n_exp, "d_in": d_in, "d_out": d_out,
    }


# ---------------------------------------------------------------------------
# Pallas kernel 1: gate-network logits  tanh(x @ W1) @ W2, tiled over tokens.
# bf16 matmuls, f32 accumulation / tanh.
# ---------------------------------------------------------------------------
def _gate_kernel(x_ref, w1_ref, w2_ref, logits_ref):
    h = jnp.tanh(jnp.dot(x_ref[...], w1_ref[...],
                         preferred_element_type=jnp.float32))   # (TM, E) f32
    logits_ref[...] = jnp.dot(h.astype(w2_ref.dtype), w2_ref[...],
                              preferred_element_type=jnp.float32)


def gate_logits(x2d, gw1_t, gw2_t, tm=None):
    T, d_in = x2d.shape
    n_exp = gw1_t.shape[1]
    if tm is None:
        tm = _default_token_tile()
    TM = min(tm, _round_up(T, 16))
    T_pad = _round_up(T, TM)
    x_pad = jnp.pad(x2d, ((0, T_pad - T), (0, 0)))

    cap = _vmem_cap_bytes()
    need = (2 * (TM * d_in * 2 + TM * n_exp * 4)
            + d_in * n_exp * 2 + n_exp * n_exp * 2 + 2 * 2**20)
    vmem_limit = int(min(cap, max(32 * 2**20, need)))

    out = pl.pallas_call(
        _gate_kernel,
        out_shape=jax.ShapeDtypeStruct((T_pad, n_exp), jnp.float32),
        grid_spec=pltpu.PrefetchScalarGridSpec(
            num_scalar_prefetch=0,
            grid=(T_pad // TM,),
            in_specs=[
                pl.BlockSpec((TM, d_in), lambda t: (t, 0)),
                pl.BlockSpec((d_in, n_exp), lambda t: (0, 0)),
                pl.BlockSpec((n_exp, n_exp), lambda t: (0, 0)),
            ],
            out_specs=pl.BlockSpec((TM, n_exp), lambda t: (t, 0)),
        ),
        compiler_params=pltpu.CompilerParams(
            dimension_semantics=("parallel",),
            vmem_limit_bytes=vmem_limit),
    )(x_pad, gw1_t, gw2_t)
    return out[:T]


# ---------------------------------------------------------------------------
# Pallas kernel 2: dense-weighted MoE of GLU experts.
# grid = (token tiles [parallel], experts [arbitrary, innermost]).
# x tile / score tile / f32 output accumulator stay resident across the
# expert axis; only the per-expert fused (gate|up) weight, bias and down
# weight stream from HBM.  Matmuls are bf16 x bf16 -> f32.
# ---------------------------------------------------------------------------
def _moe_kernel(x_ref, s_ref, bdall_ref, wgu_ref, bgu_ref, wd_ref, y_ref, *,
                e_pad):
    e = pl.program_id(1)
    s = s_ref[...]                                          # (TM, E) f32

    @pl.when(e == 0)
    def _():
        # Weighted bias-down term: sum_e s[t, e] * bd_e  == scores @ Bd_all
        y_ref[...] = jnp.dot(s, bdall_ref[...],
                             preferred_element_type=jnp.float32)

    x = x_ref[...]                                          # (TM, d_in) bf16
    # Fused gate|up projection (single matmul, lane-aligned split).
    gu = jnp.dot(x, wgu_ref[0],
                 preferred_element_type=jnp.float32) + bgu_ref[0]
    g = gu[:, :e_pad]
    u = gu[:, e_pad:]
    h = (g * jax.nn.sigmoid(g)) * u                         # SiLU(g)*u, f32

    # Per-token score for this expert from the lane-dense (TM, E) tile.
    lane = lax.broadcasted_iota(jnp.int32, s.shape, 1)
    scale = jnp.sum(jnp.where(lane == e, s, 0.0), axis=1, keepdims=True)

    # Scale h (e_pad lanes, not d_out) before the down projection.
    y_ref[...] += jnp.dot((scale * h).astype(wd_ref.dtype), wd_ref[0],
                          preferred_element_type=jnp.float32)


def moe_experts(x2d, scores, prepped, tm=None):
    T, d_in = x2d.shape
    n_exp = prepped["n_exp"]
    e_pad = prepped["e_pad"]
    d_out = prepped["d_out"]

    if tm is None:
        tm = _default_token_tile()
    TM = min(tm, _round_up(T, 16))
    cap = _vmem_cap_bytes()

    def vmem_need(tmk):
        return (2 * (tmk * d_in * 2            # x tile (bf16)
                     + tmk * n_exp * 4         # score tile (f32)
                     + tmk * d_out * 4)        # output accumulator (f32)
                + 2 * (d_in * 2 * e_pad * 2    # fused gate|up weight (bf16)
                       + 2 * e_pad * 4         # fused bias (f32)
                       + e_pad * d_out * 2)    # down weight (bf16)
                + n_exp * d_out * 4            # Bd_all (f32)
                + 2 * 2**20)                   # slack

    while TM > 16 and vmem_need(TM) > cap:
        TM = max(16, _round_up(TM // 2, 16))
    T_pad = _round_up(T, TM)
    vmem_limit = int(min(cap, max(32 * 2**20, vmem_need(TM))))

    x_pad = jnp.pad(x2d, ((0, T_pad - T), (0, 0)))
    s_pad = jnp.pad(scores.astype(jnp.float32), ((0, T_pad - T), (0, 0)))

    kernel = functools.partial(_moe_kernel, e_pad=e_pad)

    y = pl.pallas_call(
        kernel,
        out_shape=jax.ShapeDtypeStruct((T_pad, d_out), jnp.float32),
        grid_spec=pltpu.PrefetchScalarGridSpec(
            num_scalar_prefetch=0,
            grid=(T_pad // TM, n_exp),
            in_specs=[
                pl.BlockSpec((TM, d_in), lambda t, e: (t, 0)),               # x
                pl.BlockSpec((TM, n_exp), lambda t, e: (t, 0)),              # scores
                pl.BlockSpec((n_exp, d_out), lambda t, e: (0, 0)),           # Bd_all
                pl.BlockSpec((1, d_in, 2 * e_pad), lambda t, e: (e, 0, 0)),  # Wgu
                pl.BlockSpec((1, 1, 2 * e_pad), lambda t, e: (e, 0, 0)),     # bgu
                pl.BlockSpec((1, e_pad, d_out), lambda t, e: (e, 0, 0)),     # Wd
            ],
            out_specs=pl.BlockSpec((TM, d_out), lambda t, e: (t, 0)),
        ),
        compiler_params=pltpu.CompilerParams(
            dimension_semantics=("parallel", "arbitrary"),
            vmem_limit_bytes=vmem_limit),
    )(x_pad, s_pad, prepped["bd_all"], prepped["wgu"], prepped["bgu"],
      prepped["wd"])
    return y[:T]


# ---------------------------------------------------------------------------
# Glue: top-k gate, balance loss, dense score scatter (tiny, plain JAX).
# ---------------------------------------------------------------------------
def _cv_squared(x, eps=1e-10):
    x = x.astype(jnp.float32)
    if x.shape[0] == 1:
        return jnp.float32(0.0)
    return jnp.var(x, ddof=1) / (jnp.mean(x) ** 2 + eps)


def linear_glu_moe_forward(x, prepped, num_selects, balance_loss_weight=0.01):
    orig_shape = x.shape[:-1]
    d_in = x.shape[-1]
    n_exp = prepped["n_exp"]
    d_out = prepped["d_out"]

    # Single activation cast; no f32 round-trips thereafter.
    x2d = x.reshape(-1, d_in).astype(jnp.bfloat16)

    # --- gate (Pallas) ---
    logits = gate_logits(x2d, prepped["gw1_t"], prepped["gw2_t"])  # (T, E) f32
    k = min(num_selects + 1, n_exp)
    top_logits, top_indices = lax.top_k(logits, k)
    top_k_scores = jax.nn.softmax(
        top_logits[:, :num_selects].astype(jnp.float32), axis=1)
    one_hot = jax.nn.one_hot(top_indices[:, :num_selects], n_exp,
                             dtype=jnp.float32)
    scores_filtered = jnp.sum(one_hot * top_k_scores[..., None], axis=1)
    importance = scores_filtered.sum(axis=0)
    load = (scores_filtered > 0).sum(axis=0).astype(jnp.int32)
    balance_loss = balance_loss_weight * (
        _cv_squared(importance) + _cv_squared(load))

    # --- experts (hot path, Pallas) ---
    y2d = moe_experts(x2d, scores_filtered, prepped)

    y = y2d.reshape(orig_shape + (d_out,))
    return {
        "hidden_states": y,
        "balance_loss": balance_loss,
        "num_dropped_tokens": jnp.float32(-1.0),
        "gate_load": load,
        "gate_importance": importance,
    }


# ---------------------------------------------------------------------------
# Pure-JAX reference mirroring the kernel's bf16-matmul / f32-accumulate math
# (uses the RAW PyTorch-layout parameters).
# ---------------------------------------------------------------------------
def reference_forward(x, params, num_selects):
    orig_shape = x.shape[:-1]
    x2d = x.reshape(-1, x.shape[-1])
    n_exp = params["gw1"].shape[0]
    d_out = params["wd"].shape[1]
    xb = x2d.astype(jnp.bfloat16)

    h = jnp.tanh(jnp.dot(xb, params["gw1"].T.astype(jnp.bfloat16),
                         preferred_element_type=jnp.float32))
    logits = jnp.dot(h.astype(jnp.bfloat16),
                     params["gw2"].T.astype(jnp.bfloat16),
                     preferred_element_type=jnp.float32)
    top_logits, top_indices = lax.top_k(logits, min(num_selects + 1, n_exp))
    top_k_scores = jax.nn.softmax(top_logits[:, :num_selects], axis=1)
    one_hot = jax.nn.one_hot(top_indices[:, :num_selects], n_exp,
                             dtype=jnp.float32)
    scores = jnp.sum(one_hot * top_k_scores[..., None], axis=1)

    y = scores @ params["bd"].astype(jnp.float32)
    for e in range(n_exp):
        g = jnp.dot(xb, params["wg"][e].T.astype(jnp.bfloat16),
                    preferred_element_type=jnp.float32) + params["bg"][e]
        u = jnp.dot(xb, params["wu"][e].T.astype(jnp.bfloat16),
                    preferred_element_type=jnp.float32) + params["bu"][e]
        hh = (g * jax.nn.sigmoid(g)) * u
        y = y + jnp.dot((scores[:, e:e + 1] * hh).astype(jnp.bfloat16),
                        params["wd"][e].T.astype(jnp.bfloat16),
                        preferred_element_type=jnp.float32)
    return y.reshape(orig_shape + (d_out,))


# ---------------------------------------------------------------------------
# Deterministic parameter construction (shapes per LinearGLUMoELayer.__init__)
# ---------------------------------------------------------------------------
def make_params(key, input_size, hidden_size, output_size, num_experts):
    assert hidden_size % num_experts == 0
    e_sz = hidden_size // num_experts
    keys = jax.random.split(key, 8)

    def u(k, shape, fan_in):
        bound = 1.0 / (fan_in ** 0.5)
        return jax.random.uniform(k, shape, jnp.float32, -bound, bound)

    return {
        # gate network (mlp): Linear(in, E) -> tanh -> Linear(E, E)
        "gw1": u(keys[0], (num_experts, input_size), input_size),
        "gw2": u(keys[1], (num_experts, num_experts), num_experts),
        # stacked per-expert GLU weights / biases (PyTorch (out, in) layout)
        "wg": u(keys[2], (num_experts, e_sz, input_size), input_size),
        "wu": u(keys[3], (num_experts, e_sz, input_size), input_size),
        "wd": u(keys[4], (num_experts, output_size, e_sz), e_sz),
        "bg": u(keys[5], (num_experts, e_sz), input_size),
        "bu": u(keys[6], (num_experts, e_sz), input_size),
        "bd": u(keys[7], (num_experts, output_size), e_sz),
    }


if __name__ == "__main__":
    # Small, module-consistent shapes.
    batch, seq = 2, 8
    input_size, hidden_size, output_size = 32, 64, 32
    num_experts, num_selects = 4, 2

    key = jax.random.PRNGKey(0)
    pkey, xkey = jax.random.split(key)
    params = make_params(pkey, input_size, hidden_size, output_size,
                         num_experts)
    prepped = prepare_params(params)          # one-time weight relayout
    x = jax.random.normal(xkey, (batch, seq, input_size), jnp.float32)

    out = linear_glu_moe_forward(x, prepped, num_selects)
    y = jax.block_until_ready(out["hidden_states"])

    y_ref = reference_forward(x, params, num_selects)
    assert y.shape == (batch, seq, output_size)
    assert jnp.allclose(y, y_ref, rtol=1e-2, atol=1e-2), "mismatch vs reference"
    jax.block_until_ready(out["balance_loss"])
    jax.block_until_ready(out["gate_load"])
    jax.block_until_ready(out["gate_importance"])

    print("KERNEL_OK")
</pallas_src>

<mosaic_0001>
module attributes {stable_mosaic.version = 11 : i64} {
  func.func @_gate_kernel(%arg0: i32, %arg1: memref<16x32xbf16, #tpu.memory_space<vmem>>, %arg2: memref<32x4xbf16, #tpu.memory_space<vmem>>, %arg3: memref<4x4xbf16, #tpu.memory_space<vmem>>, %arg4: memref<16x4xf32, #tpu.memory_space<vmem>>) attributes {dimension_semantics = [#tpu.dimension_semantics<parallel>], iteration_bounds = array<i64: 1>, scalar_prefetch = 0 : i64, scratch_operands = 0 : i64, tpu.core_type = #tpu.core_type<tc>, window_params = [{transform_indices = @transform_0, window_bounds = array<i64: 16, 32>}, {pipeline_mode = #tpu.pipeline_mode<synchronous>, transform_indices = @transform_1, window_bounds = array<i64: 32, 4>}, {pipeline_mode = #tpu.pipeline_mode<synchronous>, transform_indices = @transform_2, window_bounds = array<i64: 4, 4>}, {transform_indices = @transform_3, window_bounds = array<i64: 16, 4>}]} {
    %c0 = arith.constant 0 : index
    %c0_0 = arith.constant 0 : index
    %0 = vector.load %arg1[%c0, %c0_0] : memref<16x32xbf16, #tpu.memory_space<vmem>>, vector<16x32xbf16>
    %c0_1 = arith.constant 0 : index
    %c0_2 = arith.constant 0 : index
    %1 = vector.load %arg2[%c0_1, %c0_2] : memref<32x4xbf16, #tpu.memory_space<vmem>>, vector<32x4xbf16>
    %cst = arith.constant dense<0.000000e+00> : vector<16x4xf32>
    %2 = tpu.matmul %0, %1, %cst {dimension_numbers = #tpu.dot_dimension_numbers<[1], [0], [0], [1], [0, 0, 1, 1], [], []>} : vector<16x32xbf16>, vector<32x4xbf16>, vector<16x4xf32> -> vector<16x4xf32>
    %3 = math.tanh %2 : vector<16x4xf32>
    %4 = arith.truncf %3 : vector<16x4xf32> to vector<16x4xbf16>
    %c0_3 = arith.constant 0 : index
    %c0_4 = arith.constant 0 : index
    %5 = vector.load %arg3[%c0_3, %c0_4] : memref<4x4xbf16, #tpu.memory_space<vmem>>, vector<4x4xbf16>
    %cst_5 = arith.constant dense<0.000000e+00> : vector<16x4xf32>
    %6 = tpu.matmul %4, %5, %cst_5 {dimension_numbers = #tpu.dot_dimension_numbers<[1], [0], [0], [1], [0, 0, 1, 1], [], []>} : vector<16x4xbf16>, vector<4x4xbf16>, vector<16x4xf32> -> vector<16x4xf32>
    %c0_6 = arith.constant 0 : index
    %c0_7 = arith.constant 0 : index
    %7 = vector.load %arg4[%c0_6, %c0_7] : memref<16x4xf32, #tpu.memory_space<vmem>>, vector<16x4xf32>
    tpu.vector_store %arg4[%c0_6, %c0_7], %6 {strides = array<i32>} : memref<16x4xf32, #tpu.memory_space<vmem>>, vector<16x4xf32>,
    return
  }
  func.func @transform_0(%arg0: i32) -> (i32, i32) {
    %c0_i32 = arith.constant 0 : i32
    %c0_i32_0 = arith.constant 0 : i32
    return %arg0, %c0_i32 : i32, i32
  }
  func.func @transform_1(%arg0: i32) -> (i32, i32) {
    %c0_i32 = arith.constant 0 : i32
    %c0_i32_0 = arith.constant 0 : i32
    %c0_i32_1 = arith.constant 0 : i32
    return %c0_i32, %c0_i32_0 : i32, i32
  }
  func.func @transform_2(%arg0: i32) -> (i32, i32) {
    %c0_i32 = arith.constant 0 : i32
    %c0_i32_0 = arith.constant 0 : i32
    %c0_i32_1 = arith.constant 0 : i32
    return %c0_i32, %c0_i32_0 : i32, i32
  }
  func.func @transform_3(%arg0: i32) -> (i32, i32) {
    %c0_i32 = arith.constant 0 : i32
    %c0_i32_0 = arith.constant 0 : i32
    return %arg0, %c0_i32 : i32, i32
  }
}

</mosaic_0001>

<bundles_post_ra>
// kernel: tpu_custom_call.1
= control target key start
LH: loop header
LB: loop body
LE: loop exit
PB: predicated region body
PF: predicated region fallthrough
CT: control target
= control target key end

     0   :  { %v175_v0 = vmov 0.0   ;;  %vm176_vm0 = vmmov 0   ;;  %vm38_vm1 = vcmask 261120   ;;  %vm91_vm2 = vcmask 1041408   ;;  %s215_s1 = inlined_call_operand.vmem [shape: bf16[32,4], index: 1, kind: input, shape index: {}]   ;;  %s216_s0 = inlined_call_operand.vmem [shape: bf16[16,32], index: 0, kind: input, shape index: {}]   ;;  %s217_s2 = inlined_call_operand.vmem [shape: bf16[4,4], index: 2, kind: input, shape index: {}]   ;;  %s218_s3 = inlined_call_operand.vmem [shape: f32[16,4], index: 3, kind: output, shape index: {}]  }
   0x1   :  { %152 = vmatprep.subr.bf16.mxu0 %v175_v0  ;;  %v168_v1 = vld [vmem:[%s215_s1] sm:$0xff]   ;;  %156 = vmatprep.mubr.msk.bf16.mxu0 %vm176_vm0, %v175_v0  ;;  %v169_v2 = vld [vmem:[%s215_s1 + $0x8] sm:$0xff]   ;;  %vm87_vm3 = vcmask 31744  }
   0x2   :  { %160 = vmatprep.subr.bf16.mxu1 %v175_v0  ;;  %162 = vmatprep.mubr.msk.bf16.mxu1 %vm176_vm0, %v175_v0  ;;  %v170_v3 = vld [vmem:[%s216_s0] sm:$0xff]  }
   0x3   :  { %153 = vmatpush3.bf16.msra.mxu0 %v168_v1  ;;  %v86_v4 = vld [vmem:[%s217_s2] sm:$0x3] }
   0x4   :  { %154 = vmatprep.subr.bf16.mxu0 %v175_v0  ;;  %v93_v5 = vsel %vm91_vm2, %v86_v4, 0 }
   0x5   :  { %161 = vmatpush3.bf16.msra.mxu1 %v93_v5 }
   0x7   :  { %155 = vmatpush3.bf16.msra.mxu0 %v169_v2 }
   0xa   :  { %157 = vmatmul.mubr.msk.bf16.vlgmr.msra.gmra.mrb[0].mxu0 %vm38_vm1, %v170_v3 }
  0xdd   :  { %v76_v6 = vpop.f32.mrb[0].mxu0 }
  0xde   :  { %v158_v7 = vpop.f32.mrb[1].mxu0  ;;  %171 = vtanh.f32 %v76_v6 }
  0xdf   :  { %v79_v8 = vpop.f32.mrb[2].mxu0 }
  0xe0   :  { %173 = vtanh.f32 %v79_v8  ;;  %v159_v9 = vpop.f32.mrb[3].mxu0 }
  0xe8   :  { %v172_v10 = vpop.eup %171 }
  0xea   :  { %v174_v11 = vpop.eup %173 }
  0xeb   :  { %v85_v12 = vpack.c.bf16 %v174_v11, %v172_v10 }
  0xed   :  { %163 = vmatmul.mubr.msk.bf16.vlgmr.msra.gmra.mrb[0].mxu1 %vm87_vm3, %v85_v12 }
 0x1c0   :  { %v129_v13 = vpop.f32.mrb[0].mxu1 }
 0x1c1   :  { %136 = vst.msk [vmem:[%s218_s3] sm:$0xff] %vm87_vm3, %v129_v13  ;;  %v164_v14 = vpop.f32.mrb[1].mxu1 }
 0x1c2   :  { %v132_v15 = vpop.f32.mrb[2].mxu1 }
 0x1c3   :  { %137 = vst.msk [vmem:[%s218_s3 + $0x8] sm:$0xff] %vm87_vm3, %v132_v15  ;;  %v165_v16 = vpop.f32.mrb[3].mxu1 }

</bundles_post_ra>
